<compile_context>
chip_gen: v7x
topology: tpu7x:2x2x1
jax: 0.10.0
libtpu: 0.0.40
codegen_flags: <defaults>
</compile_context>

<pallas_src>
import dataclasses
import functools

import numpy as np
import jax
import jax.numpy as jnp
from jax import lax
from jax.experimental import pallas as pl
from jax.experimental.pallas import tpu as pltpu

_NEG = -1.0e30  # safe "-inf" sentinel (avoids inf arithmetic / NaNs)


def _round_up(x, m):
    return (x + m - 1) // m * m


def _vmem_capacity_bytes():
    """Best-effort VMEM capacity query (used only to pick tile/limit sizes)."""
    try:
        return int(pltpu.get_tpu_info().vmem_capacity_bytes)
    except Exception:
        return 64 * 1024 * 1024  # conservative (v7x-class) fallback


# ---------------------------------------------------------------------------
# Phase 1: streaming fused log-softmax + blank / label gathers (tiled over T).
# ---------------------------------------------------------------------------
def _softmax_gather_kernel(blank, x_ref, tgt_ref, lpb_ref, lpy_ref):
    # x_ref:   (t_tile, U1, V) logits tile (bf16 or f32, native dtype)
    # tgt_ref: (U1, 1) int32 padded targets (pad id -1 never matches a vocab id)
    # lpb_ref / lpy_ref: (t_tile, U1) f32
    x = x_ref[...]
    U1, V = x.shape[1], x.shape[2]

    # Small one-hot mask built once per program (not per tile element).
    v_io = lax.broadcasted_iota(jnp.int32, (U1, V), 1)
    onehot = v_io == tgt_ref[...]                                   # (U1, V) bool

    m = jnp.max(x, axis=-1, keepdims=True)                          # native dtype
    ex = jnp.exp((x - m).astype(jnp.float32))                       # f32 only here
    lse = jnp.log(jnp.sum(ex, axis=-1)) + m[..., 0].astype(jnp.float32)

    x_blank = x[:, :, blank].astype(jnp.float32)                    # static lane slice
    zero = jnp.zeros((), x.dtype)
    # Exactly one selected lane per (t,u) row -> the sum is an exact gather.
    x_y = jnp.sum(jnp.where(onehot[None], x, zero), axis=-1).astype(jnp.float32)

    lpb_ref[...] = x_blank - lse
    lpy_ref[...] = x_y - lse


# ---------------------------------------------------------------------------
# Phase 2: RNNT forward DP over anti-diagonals on pre-skewed, diag-major data.
# ---------------------------------------------------------------------------
def _rnnt_dp_kernel(n_steps, lpb_ref, lpy_ref, beta_ref):
    # lpb_ref / lpy_ref: (n_steps, BB, U1) f32 -- row d holds anti-diagonal d.
    # beta_ref:          (BB, U1) f32 -- final beta (alpha along the last diag).
    BB, U1 = beta_ref.shape
    u_row = lax.broadcasted_iota(jnp.int32, (BB, U1), 1)
    beta0 = jnp.where(u_row == 0, 0.0, _NEG).astype(jnp.float32)

    def body(d, beta):
        b_d = lpb_ref[d - 1]                         # (BB, U1) dynamic major slice
        y_d = lpy_ref[d - 1]
        term1 = beta + b_d                           # blank from (t-1, u)
        term2 = jnp.where(u_row == 0, _NEG,
                          pltpu.roll(beta + y_d, 1, 1))  # label from (t, u-1)
        m2 = jnp.maximum(term1, term2)
        # Single-exp logaddexp: one fewer EUP push on the serial critical path.
        return m2 + jnp.log1p(jnp.exp(-jnp.abs(term1 - term2)))

    beta_ref[...] = lax.fori_loop(1, n_steps + 1, body, beta0, unroll=8)


# ---------------------------------------------------------------------------
# Wrapper
# ---------------------------------------------------------------------------
def rnnt_loss_pallas(logits, targets, logit_lengths, target_lengths,
                     blank=0, reduction='mean', t_tile=None):
    """RNNT loss (fused log_softmax, torchaudio semantics) on TPU via Pallas."""
    B, T, U1, V = logits.shape
    U = U1 - 1
    assert targets.shape == (B, U)

    tlen = logit_lengths.astype(jnp.int32)
    ulen = target_lengths.astype(jnp.int32)
    # Targets padded to 1+U, shaped (B, 1+U, 1); pad id -1 never matches.
    tgt = jnp.concatenate(
        [targets.astype(jnp.int32), jnp.full((B, 1), -1, jnp.int32)], axis=1
    ).reshape(B, U1, 1)

    # ---- generation-aware VMEM budgets ----
    cap = _vmem_capacity_bytes()
    big_vmem = cap >= 96 * 1024 * 1024            # v5e / v6e (128 MiB) vs v7x (64 MiB)
    p1_budget = (10 if big_vmem else 5) * 1024 * 1024   # logits tile bytes
    p1_limit = (96 if big_vmem else 40) * 1024 * 1024
    p2_limit = (100 if big_vmem else 48) * 1024 * 1024

    # ---- phase 1: streaming log-softmax + gathers, tiled over T --------------
    itemsize = jnp.dtype(logits.dtype).itemsize
    if t_tile is None:
        bytes_row = _round_up(U1, 8) * _round_up(V, 128) * itemsize
        rows = max(8, (p1_budget // bytes_row) // 8 * 8)
        t_tile = T if T <= rows else int(rows)
    assert t_tile == T or t_tile % 8 == 0, "t_tile must equal T or be a multiple of 8"
    nT = pl.cdiv(T, t_tile)

    lpb, lpy = pl.pallas_call(
        functools.partial(_softmax_gather_kernel, blank),
        out_shape=(jax.ShapeDtypeStruct((B, T, U1), jnp.float32),
                   jax.ShapeDtypeStruct((B, T, U1), jnp.float32)),
        grid_spec=pltpu.PrefetchScalarGridSpec(
            num_scalar_prefetch=0,
            grid=(B, nT),
            in_specs=[
                pl.BlockSpec((None, t_tile, U1, V), lambda b, t: (b, t, 0, 0)),
                pl.BlockSpec((None, U1, 1), lambda b, t: (b, 0, 0)),
            ],
            out_specs=[
                pl.BlockSpec((None, t_tile, U1), lambda b, t: (b, t, 0)),
                pl.BlockSpec((None, t_tile, U1), lambda b, t: (b, t, 0)),
            ]),
        compiler_params=pltpu.CompilerParams(
            dimension_semantics=("parallel", "parallel"),
            vmem_limit_bytes=p1_limit),
    )(logits, tgt)

    # ---- mid: mask + "blank=0 propagation" + skew (cheap XLA layout work) ----
    BB = 8 if B >= 8 else B                      # utterances packed per sublane group
    B_pad = _round_up(B, BB)
    nB = B_pad // BB
    if B_pad > B:
        pb = B_pad - B
        lpb = jnp.pad(lpb, ((0, pb), (0, 0), (0, 0)))   # explicit: no uninit reads
        lpy = jnp.pad(lpy, ((0, pb), (0, 0), (0, 0)))
        tlen_p = jnp.pad(tlen, (0, pb))
        ulen_p = jnp.pad(ulen, (0, pb))
    else:
        tlen_p, ulen_p = tlen, ulen

    Pp = T + U1                      # padded t extent
    P_rows = Pp - 1                  # number of anti-diagonals the DP consumes
    t_io = jnp.arange(Pp, dtype=jnp.int32)[None, :, None]
    u_io = jnp.arange(U1, dtype=jnp.int32)[None, None, :]
    tl = tlen_p[:, None, None]
    ul = ulen_p[:, None, None]
    zpad = jnp.zeros((B_pad, Pp - T, U1), jnp.float32)
    lpb_e = jnp.concatenate([lpb, zpad], axis=1)          # (B_pad, Pp, U1)
    lpy_e = jnp.concatenate([lpy, zpad], axis=1)
    # Valid cells keep their log-probs.  For t >= t_len at u == u_len the blank
    # log-prob is set to 0 so alpha[t_len, u_len] (= -loss) propagates unchanged
    # to the last diagonal; everything else is the -1e30 sentinel.
    LPB = jnp.where((t_io < tl) & (u_io <= ul), lpb_e,
                    jnp.where((u_io == ul) & (t_io >= tl), 0.0, _NEG))
    LPY = jnp.where((t_io < tl) & (u_io < ul), lpy_e, _NEG)

    def _skew(a):
        # (B_pad, Pp, U1) -> (Pp-1, B_pad, U1);  out[d, b, u] = a[b, d - u, u]
        x = jnp.transpose(a, (0, 2, 1))                       # (B_pad, U1, Pp)
        x = x.reshape(B_pad, U1 * Pp)[:, : U1 * (Pp - 1)]
        x = x.reshape(B_pad, U1, Pp - 1)                      # x[b,u,d] = a[b,d-u,u]
        return jnp.transpose(x, (2, 0, 1))

    lpb_sk = _skew(LPB).reshape(P_rows, nB, BB, U1)
    lpy_sk = _skew(LPY).reshape(P_rows, nB, BB, U1)

    # ---- phase 2: serial DP, BB utterances packed into sublanes --------------
    # TODO(synk): for extreme T*U1 (block > ~p2_limit) stream lpb/lpy over
    # diagonals with manual double-buffered DMA instead of whole-block residency.
    beta = pl.pallas_call(
        functools.partial(_rnnt_dp_kernel, P_rows),
        out_shape=jax.ShapeDtypeStruct((nB, BB, U1), jnp.float32),
        grid_spec=pltpu.PrefetchScalarGridSpec(
            num_scalar_prefetch=0,
            grid=(nB,),
            in_specs=[
                pl.BlockSpec((P_rows, None, BB, U1), lambda nb: (0, nb, 0, 0)),
                pl.BlockSpec((P_rows, None, BB, U1), lambda nb: (0, nb, 0, 0)),
            ],
            out_specs=pl.BlockSpec((None, BB, U1), lambda nb: (nb, 0, 0))),
        compiler_params=pltpu.CompilerParams(
            dimension_semantics=("parallel",),
            vmem_limit_bytes=p2_limit),
    )(lpb_sk, lpy_sk)

    betaf = beta.reshape(B_pad, U1)[:B]
    per_utt = -jnp.take_along_axis(betaf, ulen[:, None], axis=1)[:, 0]
    if reduction == 'mean':
        return jnp.mean(per_utt)
    if reduction == 'sum':
        return jnp.sum(per_utt)
    return per_utt


@dataclasses.dataclass
class RnntLossConfig:
    """Config of RnntLoss."""
    blank_label: int = 0
    clamp: float = -1
    reduction: str = 'mean'


class RnntLoss:
    """Pallas-TPU port of the PyTorch RnntLoss wrapper (forward only)."""

    def __init__(self, config: RnntLossConfig) -> None:
        # TODO(synk): torchaudio's `clamp` only clips *gradients*; the forward
        # value is unaffected and no backward pass is implemented here.
        self._blank = config.blank_label
        self._reduction = config.reduction

    def __call__(self, logits, targets, logits_length, targets_length):
        return rnnt_loss_pallas(logits, targets, logits_length, targets_length,
                                blank=self._blank, reduction=self._reduction)


# ---------------------- pure-numpy reference (float64) ----------------------
def _rnnt_loss_reference(logits, targets, logit_lengths, target_lengths,
                         blank=0, reduction='mean'):
    logits = np.asarray(logits, dtype=np.float64)
    m = logits.max(axis=-1, keepdims=True)
    lp = logits - m - np.log(np.exp(logits - m).sum(axis=-1, keepdims=True))
    B = logits.shape[0]
    losses = np.zeros((B,), np.float64)
    for b in range(B):
        Tb, Ub = int(logit_lengths[b]), int(target_lengths[b])
        alpha = np.full((Tb, Ub + 1), -np.inf)
        alpha[0, 0] = 0.0
        for t in range(Tb):
            for u in range(Ub + 1):
                if t == 0 and u == 0:
                    continue
                terms = []
                if t > 0:
                    terms.append(alpha[t - 1, u] + lp[b, t - 1, u, blank])
                if u > 0:
                    terms.append(alpha[t, u - 1] + lp[b, t, u - 1, int(targets[b, u - 1])])
                alpha[t, u] = terms[0] if len(terms) == 1 else np.logaddexp(terms[0], terms[1])
        losses[b] = -(alpha[Tb - 1, Ub] + lp[b, Tb - 1, Ub, blank])
    if reduction == 'mean':
        return float(losses.mean())
    if reduction == 'sum':
        return float(losses.sum())
    return losses


if __name__ == "__main__":
    key = jax.random.PRNGKey(0)
    k1, k2, k3, k4 = jax.random.split(key, 4)

    # --- small case (B < 8, single T tile) ---
    B, T, U, V = 2, 12, 4, 16
    logits = jax.random.normal(k1, (B, T, U + 1, V), dtype=jnp.float32)
    targets = jax.random.randint(k2, (B, U), 1, V, dtype=jnp.int32)
    logit_lengths = jnp.array([T, T - 3], dtype=jnp.int32)
    target_lengths = jnp.array([U, U - 1], dtype=jnp.int32)

    ref = _rnnt_loss_reference(np.asarray(logits), np.asarray(targets),
                               np.asarray(logit_lengths), np.asarray(target_lengths),
                               blank=0, reduction='mean')

    loss_fn = RnntLoss(RnntLossConfig(blank_label=0, clamp=-1, reduction='mean'))
    loss = loss_fn(logits, targets, logit_lengths, target_lengths)
    loss = jax.block_until_ready(loss)
    np.testing.assert_allclose(float(loss), ref, rtol=1e-3, atol=1e-3)

    # Explicitly exercise the streaming/tiled-over-T path (ragged last tile).
    loss_tiled = rnnt_loss_pallas(logits, targets, logit_lengths, target_lengths,
                                  blank=0, reduction='mean', t_tile=8)
    loss_tiled = jax.block_until_ready(loss_tiled)
    np.testing.assert_allclose(float(loss_tiled), ref, rtol=1e-3, atol=1e-3)

    # --- case with B >= 8 (exercises BB=8 packing, batch padding, nB=2 grid) ---
    B2, T2, U2, V2 = 9, 10, 3, 16
    logits2 = jax.random.normal(k3, (B2, T2, U2 + 1, V2), dtype=jnp.float32)
    targets2 = jax.random.randint(k4, (B2, U2), 1, V2, dtype=jnp.int32)
    tl2 = jnp.array([10, 7, 1, 10, 5, 9, 3, 10, 6], dtype=jnp.int32)
    ul2 = jnp.array([3, 2, 0, 3, 1, 3, 2, 0, 3], dtype=jnp.int32)

    ref2 = _rnnt_loss_reference(np.asarray(logits2), np.asarray(targets2),
                                np.asarray(tl2), np.asarray(ul2),
                                blank=0, reduction='mean')
    loss2 = rnnt_loss_pallas(logits2, targets2, tl2, ul2, blank=0, reduction='mean')
    loss2 = jax.block_until_ready(loss2)
    np.testing.assert_allclose(float(loss2), ref2, rtol=1e-3, atol=1e-3)

    print("KERNEL_OK")
</pallas_src>

<mosaic_0001>
module attributes {stable_mosaic.version = 11 : i64} {
  func.func @_softmax_gather_kernel(%arg0: i32, %arg1: i32, %arg2: memref<1x12x5x16xf32, #tpu.memory_space<vmem>>, %arg3: memref<1x5x1xi32, #tpu.memory_space<vmem>>, %arg4: memref<1x12x5xf32, #tpu.memory_space<vmem>>, %arg5: memref<1x12x5xf32, #tpu.memory_space<vmem>>) attributes {dimension_semantics = [#tpu.dimension_semantics<parallel>, #tpu.dimension_semantics<parallel>], iteration_bounds = array<i64: 2, 1>, scalar_prefetch = 0 : i64, scratch_operands = 0 : i64, tpu.core_type = #tpu.core_type<tc>, window_params = [{transform_indices = @transform_0, window_bounds = array<i64: 1, 12, 5, 16>}, {transform_indices = @transform_1, window_bounds = array<i64: 1, 5, 1>}, {transform_indices = @transform_2, window_bounds = array<i64: 1, 12, 5>}, {transform_indices = @transform_3, window_bounds = array<i64: 1, 12, 5>}]} {
    %c0 = arith.constant 0 : index
    %c0_0 = arith.constant 0 : index
    %c0_1 = arith.constant 0 : index
    %c0_2 = arith.constant 0 : index
    %0 = vector.load %arg2[%c0, %c0_0, %c0_1, %c0_2] : memref<1x12x5x16xf32, #tpu.memory_space<vmem>>, vector<1x12x5x16xf32>
    %1 = vector.shape_cast %0 : vector<1x12x5x16xf32> to vector<12x5x16xf32>
    %2 = tpu.iota {dimensions = array<i32: 1>} : vector<5x16xi32>
    %c0_3 = arith.constant 0 : index
    %c0_4 = arith.constant 0 : index
    %c0_5 = arith.constant 0 : index
    %3 = vector.load %arg3[%c0_3, %c0_4, %c0_5] : memref<1x5x1xi32, #tpu.memory_space<vmem>>, vector<1x5x1xi32>
    %4 = vector.shape_cast %3 : vector<1x5x1xi32> to vector<5x1xi32>
    %5 = vector.broadcast %4 : vector<5x1xi32> to vector<5x16xi32>
    %6 = arith.cmpi eq, %2, %5 : vector<5x16xi32>
    %cst = arith.constant dense<0xFF800000> : vector<12x5xf32>
    %7 = vector.multi_reduction <maximumf>, %1, %cst [2] : vector<12x5x16xf32> to vector<12x5xf32>
    %8 = vector.shape_cast %7 : vector<12x5xf32> to vector<12x5x1xf32>
    %9 = vector.broadcast %8 : vector<12x5x1xf32> to vector<12x5x16xf32>
    %10 = arith.subf %1, %9 : vector<12x5x16xf32>
    %11 = math.exp %10 : vector<12x5x16xf32>
    %cst_6 = arith.constant dense<0.000000e+00> : vector<12x5xf32>
    %12 = vector.multi_reduction <add>, %11, %cst_6 [2] : vector<12x5x16xf32> to vector<12x5xf32>
    %13 = math.log %12 : vector<12x5xf32>
    %14 = vector.shape_cast %8 : vector<12x5x1xf32> to vector<12x5xf32>
    %15 = arith.addf %13, %14 : vector<12x5xf32>
    %16 = vector.extract_strided_slice %1 {offsets = [0, 0, 0], sizes = [12, 5, 1], strides = [1, 1, 1]} : vector<12x5x16xf32> to vector<12x5x1xf32>
    %17 = vector.shape_cast %16 : vector<12x5x1xf32> to vector<12x5xf32>
    %18 = vector.shape_cast %6 : vector<5x16xi1> to vector<1x5x16xi1>
    %cst_7 = arith.constant 0.000000e+00 : f32
    %19 = vector.shape_cast %18 : vector<1x5x16xi1> to vector<1x5x16xi1>
    %20 = vector.broadcast %19 : vector<1x5x16xi1> to vector<12x5x16xi1>
    %21 = vector.broadcast %cst_7 : f32 to vector<12x5x16xf32>
    %22 = arith.select %20, %1, %21 : vector<12x5x16xi1>, vector<12x5x16xf32>
    %cst_8 = arith.constant dense<0.000000e+00> : vector<12x5xf32>
    %23 = vector.multi_reduction <add>, %22, %cst_8 [2] : vector<12x5x16xf32> to vector<12x5xf32>
    %24 = arith.subf %17, %15 : vector<12x5xf32>
    %c0_9 = arith.constant 0 : index
    %c0_10 = arith.constant 0 : index
    %c0_11 = arith.constant 0 : index
    %25 = vector.load %arg4[%c0_9, %c0_10, %c0_11] : memref<1x12x5xf32, #tpu.memory_space<vmem>>, vector<1x12x5xf32>
    %26 = vector.shape_cast %25 : vector<1x12x5xf32> to vector<12x5xf32>
    %27 = vector.shape_cast %24 : vector<12x5xf32> to vector<1x12x5xf32>
    tpu.vector_store %arg4[%c0_9, %c0_10, %c0_11], %27 {strides = array<i32>} : memref<1x12x5xf32, #tpu.memory_space<vmem>>, vector<1x12x5xf32>,
    %28 = arith.subf %23, %15 : vector<12x5xf32>
    %c0_12 = arith.constant 0 : index
    %c0_13 = arith.constant 0 : index
    %c0_14 = arith.constant 0 : index
    %29 = vector.load %arg5[%c0_12, %c0_13, %c0_14] : memref<1x12x5xf32, #tpu.memory_space<vmem>>, vector<1x12x5xf32>
    %30 = vector.shape_cast %29 : vector<1x12x5xf32> to vector<12x5xf32>
    %31 = vector.shape_cast %28 : vector<12x5xf32> to vector<1x12x5xf32>
    tpu.vector_store %arg5[%c0_12, %c0_13, %c0_14], %31 {strides = array<i32>} : memref<1x12x5xf32, #tpu.memory_space<vmem>>, vector<1x12x5xf32>,
    return
  }
  func.func @transform_0(%arg0: i32, %arg1: i32) -> (i32, i32, i32, i32) {
    %c0_i32 = arith.constant 0 : i32
    %c0_i32_0 = arith.constant 0 : i32
    %c0_i32_1 = arith.constant 0 : i32
    return %arg0, %arg1, %c0_i32, %c0_i32_0 : i32, i32, i32, i32
  }
  func.func @transform_1(%arg0: i32, %arg1: i32) -> (i32, i32, i32) {
    %c0_i32 = arith.constant 0 : i32
    %c0_i32_0 = arith.constant 0 : i32
    %c0_i32_1 = arith.constant 0 : i32
    return %arg0, %c0_i32, %c0_i32_0 : i32, i32, i32
  }
  func.func @transform_2(%arg0: i32, %arg1: i32) -> (i32, i32, i32) {
    %c0_i32 = arith.constant 0 : i32
    %c0_i32_0 = arith.constant 0 : i32
    return %arg0, %arg1, %c0_i32 : i32, i32, i32
  }
  func.func @transform_3(%arg0: i32, %arg1: i32) -> (i32, i32, i32) {
    %c0_i32 = arith.constant 0 : i32
    %c0_i32_0 = arith.constant 0 : i32
    return %arg0, %arg1, %c0_i32 : i32, i32, i32
  }
}

</mosaic_0001>

<bundles_post_ra>
// kernel: tpu_custom_call.1
= control target key start
LH: loop header
LB: loop body
LE: loop exit
PB: predicated region body
PF: predicated region fallthrough
CT: control target
= control target key end

     0   :  { %s967_s12 = smov 0   ;;  %s969_s13 = smov 0   ;;  %s1317_s0 = inlined_call_operand.vmem [shape: f32[2,12,5,16], index: 0, kind: input, shape index: {}]   ;;  %s1318_s1 = inlined_call_operand.vmem [shape: s32[2,5,1], index: 1, kind: input, shape index: {}]   ;;  %s1319_s2 = inlined_call_operand.vmem [shape: f32[2,12,5], index: 2, kind: output, shape index: {0}]   ;;  %s1320_s3 = inlined_call_operand.vmem [shape: f32[2,12,5], index: 3, kind: output, shape index: {1}]  }
   0x1   :  { %s971_s14 = smov 0  }
   0x2 LB: > { %s26_s15 = sadd.s32 1, %s940_s13  ;;  %p835_p0 = scmp.ge.s32.totalorder %s944_s14, 1  ;;  %s944_s14 = sphi %s971_s14, %s14_s14   ;;  %s940_s13 = sphi %s969_s13, %s1324_s13   ;;  %s936_s12 = sphi %s967_s12, %s1323_s12  }
   0x3   : > { %p28_p1 = scmp.ge.s32.totalorder %s26_s15, 2  ;;  %p172_p2 = scmp.lt.s32.totalorder %s944_s14, 3 }
   0x5   : > { %s1326_s15 = smov (%p28_p1, %s26_s15), 0  ;;  %p173_p3 = pnand %p835_p0, %p172_p2 }
   0x6   : > { %p218_p4 = scmp.lt.s32.totalorder (!%p173_p3), %s936_s12, 1  ;;  %vm270_vm0 = vcmask (!%p173_p3), 126976   ;;  %v946_v24 = vmov (!%p173_p3), 0   ;;  %vm573_vm2 = vcmask (!%p173_p3), 1041409   ;;  %vm575_vm3 = vcmask (!%p173_p3), 1042434  }
   0x7   : > { %176 = sbr.rel (%p173_p3) target bundleno = 666 (0x29a), region = 28  ;;  %872 = vset.pattern.permute.xlu0 (!%p173_p3), %v946_v24  ;;  %873 = vset.pattern.permute.xlu1 (!%p173_p3), %v946_v24  ;;  %vm577_vm4 = vcmask (!%p173_p3), 1043459   ;;  %vm579_vm5 = vcmask (!%p173_p3), 1044484   ;;  %vm581_vm6 = vcmask (!%p173_p3), 1045509   ;;  %vm594_vm7 = vcmask (!%p173_p3), 35840  }
   0x8   : > { %vm583_vm8 = vcmask (!%p173_p3), 1046534   ;;  %vm585_vm9 = vcmask (!%p173_p3), 1047559   ;;  %vm592_vm10 = vcmask (!%p173_p3), 39936  }
   0xe   : > { %s1328_s12 = smov (!%p218_p4, %s936_s12), 1 }
   0xf   : > { %s846_s16 = smul.u32 96, %s1328_s12  ;;  %s837_s20 = sshll.u32 %s1328_s12, 3 }
  0x10   : > { %s230_s23 = scalar_lea.vmem %s1318_s1, %s837_s20  ;;  %s844_s24 = sshll.u32 %s1328_s12, 4 }
  0x11   : > { %s991_s19 = scalar_lea.vmem %s1317_s0, %s846_s16  ;;  %s249_s27 = scalar_lea.vmem %s1320_s3, %s844_s24 }
  0x12   : > { %v994_v0 = vld [vmem:[%s991_s19] sm:$0x1f]  ;;  %v997_v1 = vld [vmem:[%s991_s19 + $0x10] sm:$0x1f]  ;;  %v1000_v2 = vld [vmem:[%s991_s19 + $0x8] sm:$0x1f]  ;;  %s239_s30 = scalar_lea.vmem %s1319_s2, %s844_s24 }
  0x13   : > { %v271_v3 = vsel %vm270_vm0, %v994_v0, -inf  ;;  %v277_v4 = vsel %vm270_vm0, %v997_v1, -inf  ;;  %v1007_v5 = vld [vmem:[%s991_s19 + $0x18] sm:$0x1f]  ;;  %v274_v6 = vsel %vm270_vm0, %v1000_v2, -inf }
  0x14   : > { %272 = vmax.xlane.f32.xlu0 %v271_v3  ;;  %278 = vmax.xlane.f32.xlu1 %v277_v4  ;;  %v280_v7 = vsel %vm270_vm0, %v1007_v5, -inf  ;;  %v1014_v8 = vld [vmem:[%s991_s19 + $0x20] sm:$0x1f]  ;;  %v1017_v9 = vld [vmem:[%s991_s19 + $0x28] sm:$0x1f] }
  0x15   : > { %v283_v10 = vsel %vm270_vm0, %v1014_v8, -inf  ;;  %v286_v11 = vsel %vm270_vm0, %v1017_v9, -inf  ;;  %v1024_v12 = vld [vmem:[%s991_s19 + $0x40] sm:$0x1f]  ;;  %v1027_v13 = vld [vmem:[%s991_s19 + $0x48] sm:$0x1f] }
  0x16   : > { %v295_v14 = vsel %vm270_vm0, %v1024_v12, -inf  ;;  %v298_v15 = vsel %vm270_vm0, %v1027_v13, -inf  ;;  %v1034_v16 = vld [vmem:[%s991_s19 + $0x30] sm:$0x1f]  ;;  %v1044_v20 = vld [vmem:[%s991_s19 + $0x38] sm:$0x1f] }
  0x17   : > { %v1037_v17 = vld [vmem:[%s991_s19 + $0x50] sm:$0x1f]  ;;  %v289_v18 = vsel %vm270_vm0, %v1034_v16, -inf  ;;  %v292_v21 = vsel %vm270_vm0, %v1044_v20, -inf  ;;  %v1049_v22 = vld [vmem:[%s991_s19 + $0x58] sm:$0x1f] }
  0x18   : > { %275 = vmax.xlane.f32.xlu0 %v274_v6  ;;  %281 = vmax.xlane.f32.xlu1 %v280_v7  ;;  %v301_v19 = vsel %vm270_vm0, %v1037_v17, -inf  ;;  %v304_v23 = vsel %vm270_vm0, %v1049_v22, -inf }
  0x1c   : > { %284 = vmax.xlane.f32.xlu0 %v283_v10  ;;  %287 = vmax.xlane.f32.xlu1 %v286_v11 }
  0x20   : > { %296 = vmax.xlane.f32.xlu0 %v295_v14  ;;  %299 = vmax.xlane.f32.xlu1 %v298_v15 }
  0x24   : > { %290 = vmax.xlane.f32.xlu0 %v289_v18  ;;  %302 = vmax.xlane.f32.xlu1 %v301_v19 }
  0x28   : > { %293 = vmax.xlane.f32.xlu0 %v292_v21  ;;  %305 = vmax.xlane.f32.xlu1 %v304_v23 }
  0xa1   : > { %v1053_v25 = vpop.xlane.xlu0 %272  ;;  %v1055_v26 = vpop.xlane.xlu1 %278 }
  0xa2   : > { %v307_v27 = vsub.f32 %v994_v0, %v1053_v25  ;;  %v309_v28 = vsub.f32 %v997_v1, %v1055_v26 }
  0xa4   : > { %v319_v29 = vmul.f32 1.442695, %v307_v27  ;;  %v323_v30 = vmul.f32 1.442695, %v309_v28 }
  0xa5   : > { %v1061_v31 = vpop.xlane.xlu0 %275  ;;  %v1063_v32 = vpop.xlane.xlu1 %281 }
  0xa6   : > { %874 = vpow2.f32 %v319_v29  ;;  %v308_v33 = vsub.f32 %v1000_v2, %v1061_v31  ;;  %v310_v34 = vsub.f32 %v1007_v5, %v1063_v32 }
  0xa7   : > { %876 = vpow2.f32 %v323_v30  ;;  %v265_v30 = vld [vmem:[%s230_s23] sm:$0x1f] }
  0xa8   : > { %v321_v35 = vmul.f32 1.442695, %v308_v33  ;;  %v325_v36 = vmul.f32 1.442695, %v310_v34 }
  0xa9   : > { %v1069_v37 = vpop.xlane.xlu0 %284  ;;  %v1071_v38 = vpop.xlane.xlu1 %287 }
  0xaa   : > { %878 = vpow2.f32 %v321_v35  ;;  %v311_v39 = vsub.f32 %v1014_v8, %v1069_v37  ;;  %v312_v40 = vsub.f32 %v1017_v9, %v1071_v38 }
  0xab   : > { %880 = vpow2.f32 %v325_v36 }
  0xac   : > { %v327_v41 = vmul.f32 1.442695, %v311_v39  ;;  %v329_v42 = vmul.f32 1.442695, %v312_v40 }
  0xad   : > { %v1077_v43 = vpop.xlane.xlu0 %296  ;;  %v1079_v44 = vpop.xlane.xlu1 %299 }
  0xae   : > { %882 = vpow2.f32 %v327_v41  ;;  %v315_v45 = vsub.f32 %v1024_v12, %v1077_v43  ;;  %v316_v46 = vsub.f32 %v1027_v13, %v1079_v44 }
  0xaf   : > { %884 = vpow2.f32 %v329_v42  ;;  %v263_v42 = vlaneseq }
  0xb0   : > { %v875_v47 = vpop.eup %874  ;;  %v335_v48 = vmul.f32 1.442695, %v315_v45  ;;  %v337_v49 = vmul.f32 1.442695, %v316_v46 }
  0xb1   : > { %v877_v50 = vpop.eup %876  ;;  %v1085_v51 = vpop.xlane.xlu0 %290  ;;  %v343_v52 = vsel %vm270_vm0, %v875_v47, 0.0  ;;  %v1123_v47 = vand.u32 127, %v263_v42 }
  0xb2   : > { %v1088_v53 = vpop.xlane.xlu1 %302  ;;  %886 = vpow2.f32 %v335_v48  ;;  %v313_v54 = vsub.f32 %v1034_v16, %v1085_v51  ;;  %344 = vadd.xlane.f32.xlu0 %v343_v52  ;;  %v349_v56 = vsel %vm270_vm0, %v877_v50, 0.0 }
  0xb3   : > { %v317_v55 = vsub.f32 %v1037_v17, %v1088_v53  ;;  %888 = vpow2.f32 %v337_v49 }
  0xb4   : > { %v879_v57 = vpop.eup %878  ;;  %v331_v58 = vmul.f32 1.442695, %v313_v54 }
  0xb5   : > { %v339_v59 = vmul.f32 1.442695, %v317_v55  ;;  %v881_v60 = vpop.eup %880  ;;  %v1095_v61 = vpop.xlane.xlu0 %293  ;;  %v346_v62 = vsel %vm270_vm0, %v879_v57, 0.0 }
  0xb6   : > { %890 = vpow2.f32 %v331_v58  ;;  %v314_v63 = vsub.f32 %v1044_v20, %v1095_v61  ;;  %350 = vadd.xlane.f32.xlu0 %v349_v56  ;;  %347 = vadd.xlane.f32.xlu1 %v346_v62  ;;  %v352_v3 = vsel %vm270_vm0, %v881_v60, 0.0  ;;  %v1114_v36 = vpop.xlane.xlu1 %305 }
  0xb7   : > { %892 = vpow2.f32 %v339_v59  ;;  %v318_v57 = vsub.f32 %v1049_v22, %v1114_v36 }
  0xb8   : > { %v883_v4 = vpop.eup %882  ;;  %v333_v6 = vmul.f32 1.442695, %v314_v63 }
  0xb9   : > { %v885_v7 = vpop.eup %884  ;;  %v355_v10 = vsel %vm270_vm0, %v883_v4, 0.0  ;;  %v341_v60 = vmul.f32 1.442695, %v318_v57 }
  0xba   : > { %894 = vpow2.f32 %v333_v6  ;;  %353 = vadd.xlane.f32.xlu1 %v352_v3  ;;  %356 = vadd.xlane.f32.xlu0 %v355_v10  ;;  %v358_v11 = vsel %vm270_vm0, %v885_v7, 0.0 }
  0xbc   : > { %v887_v14 = vpop.eup %886 }
  0xbd   : > { %v889_v15 = vpop.eup %888  ;;  %v367_v18 = vsel %vm270_vm0, %v887_v14, 0.0 }
  0xbe   : > { %359 = vadd.xlane.f32.xlu1 %v358_v11  ;;  %368 = vadd.xlane.f32.xlu0 %v367_v18  ;;  %v370_v19 = vsel %vm270_vm0, %v889_v15, 0.0 }
  0xc0   : > { %v891_v21 = vpop.eup %890 }
  0xc1   : > { %v893_v23 = vpop.eup %892  ;;  %v361_v24 = vsel %vm270_vm0, %v891_v21, 0.0 }
  0xc2   : > { %371 = vadd.xlane.f32.xlu1 %v370_v19  ;;  %362 = vadd.xlane.f32.xlu0 %v361_v24  ;;  %v373_v27 = vsel %vm270_vm0, %v893_v23, 0.0 }
  0xc4   : > { %v895_v28 = vpop.eup %894 }
  0xc5   : > { %v364_v29 = vsel %vm270_vm0, %v895_v28, 0.0 }
  0xc6   : > { %374 = vadd.xlane.f32.xlu1 %v373_v27  ;;  %365 = vadd.xlane.f32.xlu0 %v364_v29 }
  0xdc   : > { %267 = vperm.xlu0 %872, %v265_v30  }
 0x13f   : > { %v345_v33 = vpop.xlane.xlu0 %344 }
 0x143   : > { %v351_v34 = vpop.xlane.xlu0 %350  ;;  %v348_v40 = vpop.xlane.xlu1 %347 }
 0x147   : > { %v1112_v35 = vpop.xlane.xlu0 %356  ;;  %v354_v45 = vpop.xlane.xlu1 %353 }
 0x14b   : > { %v1116_v39 = vpop.xlane.xlu0 %368  ;;  %v360_v48 = vpop.xlane.xlu1 %359 }
 0x14c   : > { %896 = vlog2.f32 %v360_v48 }
 0x14d   : > { %898 = vpow2.f32 %v341_v60 }
 0x14e   : > { %900 = vlog2.f32 %v345_v33 }
 0x14f   : > { %v1118_v41 = vpop.xlane.xlu0 %362  ;;  %902 = vlog2.f32 %v348_v40 }
 0x150   : > { %904 = vlog2.f32 %v351_v34 }
 0x151   : > { %906 = vlog2.f32 %v354_v45 }
 0x152   : > { %908 = vlog2.f32 %v1112_v35 }
 0x153   : > { %v1120_v46 = vpop.xlane.xlu0 %365  ;;  %910 = vlog2.f32 %v1116_v39 }
 0x156   : > { %v897_v4 = vpop.eup %896 }
 0x157   : > { %v390_v7 = vmul.f32 0.6931472, %v897_v4  ;;  %v899_v18 = vpop.eup %898 }
 0x158   : > { %v376_v23 = vsel %vm270_vm0, %v899_v18, 0.0 }
 0x159   : > { %v1157_v14 = vadd.f32 %v390_v7, %v1071_v38 }
 0x15b   : > { %v268_v49 = vpop.permute.xlu0 %267  ;;  %v470_v21 = vsub.f32 %v1017_v9, %v1157_v14 }
 0x15c   : > { %vm1126_vm1 = vcmp.eq.s32.totalorder %v1123_v47, %v268_v49 }
 0x15d   : > { %v428_v52 = vsel %vm1126_vm1, %v1049_v22, 0.0  ;;  %v417_v54 = vsel %vm1126_vm1, %v994_v0, 0.0  ;;  %v418_v58 = vsel %vm1126_vm1, %v1000_v2, 0.0  ;;  %v419_v62 = vsel %vm1126_vm1, %v997_v1, 0.0 }
 0x15e   : > { %v462_v55 = vsel %vm270_vm0, %v428_v52, 0.0  ;;  %v429_v56 = vsel %vm270_vm0, %v417_v54, 0.0  ;;  %v432_v59 = vsel %vm270_vm0, %v418_v58, 0.0  ;;  %v435_v63 = vsel %vm270_vm0, %v419_v62, 0.0  ;;  %v901_v54 = vpop.eup %900 }
 0x15f   : > { %463 = vadd.xlane.f32.xlu0 %v462_v55  ;;  %430 = vadd.xlane.f32.xlu1 %v429_v56  ;;  %v420_v3 = vsel %vm1126_vm1, %v1007_v5, 0.0  ;;  %v421_v10 = vsel %vm1126_vm1, %v1014_v8, 0.0  ;;  %v422_v15 = vsel %vm1126_vm1, %v1017_v9, 0.0  ;;  %v425_v38 = vsel %vm1126_vm1, %v1024_v12, 0.0  ;;  %v903_v56 = vpop.eup %902 }
 0x160   : > { %v438_v6 = vsel %vm270_vm0, %v420_v3, 0.0  ;;  %v441_v11 = vsel %vm270_vm0, %v421_v10, 0.0  ;;  %v444_v19 = vsel %vm270_vm0, %v422_v15, 0.0  ;;  %v453_v24 = vsel %vm270_vm0, %v425_v38, 0.0  ;;  %v905_v58 = vpop.eup %904 }
 0x161   : > { %v426_v27 = vsel %vm1126_vm1, %v1027_v13, 0.0  ;;  %v423_v9 = vsel %vm1126_vm1, %v1034_v16, 0.0  ;;  %v427_v30 = vsel %vm1126_vm1, %v1037_v17, 0.0  ;;  %v424_v49 = vsel %vm1126_vm1, %v1044_v20, 0.0  ;;  %v907_v45 = vpop.eup %906 }
 0x162   : > { %v456_v28 = vsel %vm270_vm0, %v426_v27, 0.0  ;;  %v447_v29 = vsel %vm270_vm0, %v423_v9, 0.0  ;;  %v459_v48 = vsel %vm270_vm0, %v427_v30, 0.0  ;;  %v450_v52 = vsel %vm270_vm0, %v424_v49, 0.0  ;;  %v909_v62 = vpop.eup %908 }
 0x163   : > { %433 = vadd.xlane.f32.xlu1 %v432_v59  ;;  %v380_v55 = vmul.f32 0.6931472, %v901_v54  ;;  %v382_v57 = vmul.f32 0.6931472, %v903_v56  ;;  %v384_v40 = vmul.f32 0.6931472, %v905_v58  ;;  %v372_v59 = vpop.xlane.xlu1 %371  ;;  %v911_v3 = vpop.eup %910 }
 0x164   : > { %912 = vlog2.f32 %v372_v59  ;;  %v388_v39 = vmul.f32 0.6931472, %v909_v62  ;;  %v396_v4 = vmul.f32 0.6931472, %v911_v3 }
 0x165   : > { %v1188_v33 = vadd.f32 %v380_v55, %v1053_v25  ;;  %v1192_v50 = vadd.f32 %v382_v57, %v1061_v31  ;;  %v1197_v35 = vadd.f32 %v384_v40, %v1055_v26  ;;  %v386_v25 = vmul.f32 0.6931472, %v907_v45 }
 0x166   : > { %914 = vlog2.f32 %v1118_v41  ;;  %v1208_v26 = vadd.f32 %v388_v39, %v1069_v37 }
 0x167   : > { %436 = vadd.xlane.f32.xlu1 %v435_v63  ;;  %v465_v34 = vsub.f32 %v994_v0, %v1188_v33  ;;  %v466_v60 = vsub.f32 %v1000_v2, %v1192_v50  ;;  %v1203_v31 = vadd.f32 %v386_v25, %v1063_v32  ;;  %v375_v63 = vpop.xlane.xlu1 %374  ;;  %v467_v0 = vsub.f32 %v997_v1, %v1197_v35 }
 0x168   : > { %916 = vlog2.f32 %v375_v63  ;;  %v1214_v32 = vadd.f32 %v396_v4, %v1077_v43  ;;  %v469_v1 = vsub.f32 %v1014_v8, %v1208_v26 }
 0x169   : > { %v468_v2 = vsub.f32 %v1007_v5, %v1203_v31  ;;  %918 = vlog2.f32 %v1120_v46 }
 0x16b   : > { %439 = vadd.xlane.f32.xlu1 %v438_v6 }
 0x16e   : > { %v913_v6 = vpop.eup %912 }
 0x16f   : > { %442 = vadd.xlane.f32.xlu1 %v441_v11  ;;  %v398_v41 = vmul.f32 0.6931472, %v913_v6  ;;  %v473_v11 = vsub.f32 %v1024_v12, %v1214_v32 }
 0x170   : > { %v915_v7 = vpop.eup %914 }
 0x171   : > { %v412_v37 = vadd.f32 %v398_v41, %v1079_v44  ;;  %v392_v10 = vmul.f32 0.6931472, %v915_v7 }
 0x172   : > { %v917_v5 = vpop.eup %916 }
 0x173   : > { %445 = vadd.xlane.f32.xlu1 %v444_v19  ;;  %v1222_v15 = vadd.f32 %v392_v10, %v1085_v51  ;;  %v400_v46 = vmul.f32 0.6931472, %v917_v5  ;;  %v474_v43 = vsub.f32 %v1027_v13, %v412_v37  ;;  %v919_v18 = vpop.eup %918 }
 0x174   : > { %v394_v19 = vmul.f32 0.6931472, %v919_v18 }
 0x175   : > { %505 = vperm.xlu0 %872, %v470_v21   ;;  %v413_v8 = vadd.f32 %v400_v46, %v1088_v53  ;;  %v471_v44 = vsub.f32 %v1034_v16, %v1222_v15 }
 0x176   : > { %v1229_v21 = vadd.f32 %v394_v19, %v1095_v61  ;;  %v526_v61 = vshrl.u32 %v263_v42, 7 }
 0x177   : > { %377 = vadd.xlane.f32.xlu1 %v376_v23  ;;  %v475_v12 = vsub.f32 %v1037_v17, %v413_v8 }
 0x178   : > { %v472_v51 = vsub.f32 %v1044_v20, %v1229_v21 }
 0x17b   : > { %454 = vadd.xlane.f32.xlu1 %v453_v24 }
 0x17f   : > { %457 = vadd.xlane.f32.xlu1 %v456_v28 }
 0x183   : > { %448 = vadd.xlane.f32.xlu1 %v447_v29 }
 0x187   : > { %460 = vadd.xlane.f32.xlu1 %v459_v48 }
 0x18b   : > { %451 = vadd.xlane.f32.xlu1 %v450_v52  ;;  %v1238_v52 = vsub.s32 %v1123_v47, %v526_v61 }
 0x19c   : > { %490 = vperm.xlu1 %873, %v465_v34  }
 0x1a0   : > { %493 = vperm.xlu1 %873, %v466_v60  }
 0x1a4   : > { %496 = vperm.xlu1 %873, %v467_v0  }
 0x1a8   : > { %499 = vperm.xlu1 %873, %v468_v2  }
 0x1ac   : > { %502 = vperm.xlu1 %873, %v469_v1  }
 0x1b0   : > { %514 = vperm.xlu1 %873, %v473_v11  }
 0x1b4   : > { %517 = vperm.xlu1 %873, %v474_v43  }
 0x1b8   : > { %508 = vperm.xlu1 %873, %v471_v44  }
 0x1bc   : > { %520 = vperm.xlu1 %873, %v475_v12  }
 0x1c0   : > { %511 = vperm.xlu1 %873, %v472_v51  }
 0x1ec   : > { %v431_v13 = vpop.xlane.xlu1 %430  ;;  %v464_v58 = vpop.xlane.xlu0 %463 }
 0x1ed   : > { %v596_v54 = vsub.f32 %v431_v13, %v1188_v33 }
 0x1f0   : > { %v434_v23 = vpop.xlane.xlu1 %433 }
 0x1f1   : > { %v597_v17 = vsub.f32 %v434_v23, %v1192_v50 }
 0x1f3   : > { %v627_v50 = vrot.slane %v597_v17, %v1238_v52 }
 0x1f4   : > { %v437_v38 = vpop.xlane.xlu1 %436 }
 0x1f5   : > { %v598_v30 = vsub.f32 %v437_v38, %v1197_v35 }
 0x1f7   : > { %v631_v40 = vrot.slane %v598_v30, %v1238_v52 }
 0x1f8   : > { %v440_v24 = vpop.xlane.xlu1 %439 }
 0x1f9   : > { %v599_v55 = vsub.f32 %v440_v24, %v1203_v31 }
 0x1fb   : > { %v635_v25 = vrot.slane %v599_v55, %v1238_v52 }
 0x1fc   : > { %v443_v53 = vpop.xlane.xlu1 %442 }
 0x1fd   : > { %v600_v56 = vsub.f32 %v443_v53, %v1208_v26 }
 0x1ff   : > { %v639_v62 = vrot.slane %v600_v56, %v1238_v52 }
 0x200   : > { %v446_v27 = vpop.xlane.xlu1 %445 }
 0x201   : > { %v601_v47 = vsub.f32 %v446_v27, %v1157_v14 }
 0x203   : > { %v643_v39 = vrot.slane %v601_v47, %v1238_v52 }
 0x204   : > { %v378_v28 = vpop.xlane.xlu1 %377 }
 0x205   : > { %920 = vlog2.f32 %v378_v28  ;;  %v506_v28 = vpop.permute.xlu0 %505 }
 0x208   : > { %v455_v16 = vpop.xlane.xlu1 %454 }
 0x209   : > { %v604_v57 = vsub.f32 %v455_v16, %v1214_v32 }
 0x20b   : > { %v655_v14 = vrot.slane %v604_v57, %v1238_v52 }
 0x20c   : > { %v458_v9 = vpop.xlane.xlu1 %457 }
 0x20d   : > { %v605_v20 = vsub.f32 %v458_v9, %v412_v37 }
 0x20f   : > { %v921_v29 = vpop.eup %920  ;;  %v659_v33 = vrot.slane %v605_v20, %v1238_v52 }
 0x210   : > { %v402_v48 = vmul.f32 0.6931472, %v921_v29  ;;  %v449_v49 = vpop.xlane.xlu1 %448 }
 0x211   : > { %v602_v34 = vsub.f32 %v449_v49, %v1222_v15  ;;  %v675_v3 = vsel %vm573_vm2, %v659_v33, %v655_v14 }
 0x212   : > { %v414_v42 = vadd.f32 %v402_v48, %v1114_v36  ;;  %v623_v36 = vrot.slane %v596_v54, %v1238_v52  ;;  %v548_v48 = vrot.slane %v506_v28, %v1238_v52 }
 0x213   : > { %v647_v26 = vrot.slane %v602_v34, %v1238_v52 }
 0x214   : > { %v607_v59 = vsub.f32 %v464_v58, %v414_v42  ;;  %v461_v45 = vpop.xlane.xlu1 %460  ;;  %v476_v35 = vsub.f32 %v1049_v22, %v414_v42  ;;  %v668_v31 = vsel %vm573_vm2, %v627_v50, %v623_v36 }
 0x215   : > { %v606_v60 = vsub.f32 %v461_v45, %v413_v8  ;;  %v669_v63 = vsel %vm575_vm3, %v631_v40, %v668_v31 }
 0x216   : > { %523 = vperm.xlu0 %872, %v476_v35   ;;  %v667_v0 = vrot.slane %v607_v59, %v1238_v52  ;;  %v670_v2 = vsel %vm577_vm4, %v635_v25, %v669_v63 }
 0x217   : > { %v663_v22 = vrot.slane %v606_v60, %v1238_v52  ;;  %v671_v41 = vsel %vm579_vm5, %v639_v62, %v670_v2 }
 0x218   : > { %v452_v4 = vpop.xlane.xlu1 %451  ;;  %v672_v7 = vsel %vm581_vm6, %v643_v39, %v671_v41 }
 0x219   : > { %v676_v6 = vsel %vm575_vm3, %v663_v22, %v675_v3  ;;  %v603_v32 = vsub.f32 %v452_v4, %v1229_v21  ;;  %v673_v10 = vsel %vm583_vm8, %v647_v26, %v672_v7 }
 0x21a   : > { %v677_v1 = vsel %vm577_vm4, %v667_v0, %v676_v6 }
 0x21b   : > { %v651_v37 = vrot.slane %v603_v32, %v1238_v52  ;;  %681 = vst.msk [vmem:[%s249_s27 + $0x8] sm:$0xf] %vm594_vm7, %v677_v1 }
 0x21c   : > { %v491_v11 = vpop.permute.xlu1 %490 }
 0x21d   : > { %v674_v5 = vsel %vm585_vm9, %v651_v37, %v673_v10  ;;  %v528_v38 = vrot.slane %v491_v11, %v1238_v52 }
 0x21e   : > { %680 = vst.msk [vmem:[%s249_s27] sm:$0xff] %vm592_vm10, %v674_v5 }
 0x220   : > { %v494_v15 = vpop.permute.xlu1 %493 }
 0x221   : > { %v532_v12 = vrot.slane %v494_v15, %v1238_v52 }
 0x223   : > { %v574_v27 = vsel %vm573_vm2, %v532_v12, %v528_v38 }
 0x224   : > { %v497_v46 = vpop.permute.xlu1 %496 }
 0x225   : > { %v536_v13 = vrot.slane %v497_v46, %v1238_v52 }
 0x227   : > { %v576_v16 = vsel %vm575_vm3, %v536_v13, %v574_v27 }
 0x228   : > { %v500_v43 = vpop.permute.xlu1 %499 }
 0x229   : > { %v540_v24 = vrot.slane %v500_v43, %v1238_v52 }
 0x22b   : > { %v578_v61 = vsel %vm577_vm4, %v540_v24, %v576_v16 }
 0x22c   : > { %v503_v18 = vpop.permute.xlu1 %502 }
 0x22d   : > { %v544_v53 = vrot.slane %v503_v18, %v1238_v52 }
 0x22f   : > { %v580_v17 = vsel %vm579_vm5, %v544_v53, %v578_v61 }
 0x230   : > { %v515_v8 = vpop.permute.xlu1 %514  ;;  %v582_v54 = vsel %vm581_vm6, %v548_v48, %v580_v17 }
 0x231   : > { %v560_v44 = vrot.slane %v515_v8, %v1238_v52 }
 0x234   : > { %v518_v19 = vpop.permute.xlu1 %517 }
 0x235   : > { %v564_v21 = vrot.slane %v518_v19, %v1238_v52 }
 0x237   : > { %v587_v51 = vsel %vm573_vm2, %v564_v21, %v560_v44 }
 0x238   : > { %v509_v23 = vpop.permute.xlu1 %508 }
 0x239   : > { %v552_v30 = vrot.slane %v509_v23, %v1238_v52 }
 0x23b   : > { %v584_v56 = vsel %vm583_vm8, %v552_v30, %v582_v54 }
 0x23c   : > { %v521_v9 = vpop.permute.xlu1 %520 }
 0x23d   : > { %v568_v29 = vrot.slane %v521_v9, %v1238_v52 }
 0x23f   : > { %v588_v20 = vsel %vm575_vm3, %v568_v29, %v587_v51 }
 0x240   : > { %v512_v49 = vpop.permute.xlu1 %511 }
 0x241   : > { %v556_v55 = vrot.slane %v512_v49, %v1238_v52 }
 0x243   : > { %v586_v42 = vsel %vm585_vm9, %v556_v55, %v584_v56 }
 0x244   : > { %593 = vst.msk [vmem:[%s239_s30] sm:$0xff] %vm592_vm10, %v586_v42 }
 0x295   : > { %v524_v57 = vpop.permute.xlu0 %523 }
 0x296   : > { %v572_v58 = vrot.slane %v524_v57, %v1238_v52 }
 0x298   : > { %v589_v50 = vsel %vm577_vm4, %v572_v58, %v588_v20 }
 0x299   : > { %595 = vst.msk [vmem:[%s239_s30 + $0x8] sm:$0xf] %vm594_vm7, %v589_v50 }
 0x29a PF: > { %s14_s14 = sadd.s32 1, %s944_s14   ;;  %s1323_s12 = smov %s940_s13 }
 0x29b   : > { %p11_p5 = scmp.ge.s32.totalorder %s14_s14, 4   ;;  %s1324_s13 = smov %s1326_s15 }
 0x29d   :  { %13 = sbr.rel (!%p11_p5) target bundleno = 2 (0x2), region = 73 }

</bundles_post_ra>
